<compile_context>
chip_gen: v7x
topology: tpu7x:2x2x1
jax: 0.10.0
libtpu: 0.0.40
codegen_flags: <defaults>
</compile_context>

<pallas_src>
import functools

import jax
import jax.numpy as jnp
from jax.experimental import pallas as pl
from jax.experimental.pallas import tpu as pltpu

BN_EPS = 1e-5
_Z_NORM_EPS = 1e-12


def _hyperbolic_pp_kernel(x_ref, w_ref, zn_ref, invd_ref, gamma_ref, beta_ref,
                          out_ref, acc_ref, *, inv_c, inv_b):
    """One (padded) feature tile of the fused forward pass.

    Grid axis 0 walks the feature tiles in reverse block order (index_map is
    num_tiles-1-j), so the tile holding output column 0 (the x0 slot, whose
    weight column is zero) is handled at the final grid step, once acc_ref
    holds sum(bn^2) over every feature column.
    """
    j = pl.program_id(0)

    @pl.when(j == 0)
    def _init():
        acc_ref[...] = jnp.zeros_like(acc_ref)

    # ---- lorentz_dist2plane: numerator = X @ [-w0; wr]  (single MXU matmul)
    num = jnp.dot(x_ref[...], w_ref[...], preferred_element_type=jnp.float32)
    u = num * invd_ref[...]                       # precomputed 1/(||z||*sqrt(c))
    # sign-stable arcsinh: sign(u) * log(|u| + sqrt(u^2 + 1))
    au = jnp.abs(u)
    asinh_u = jnp.where(u < 0.0, -1.0, 1.0) * jnp.log(au + jnp.sqrt(au * au + 1.0))
    dist = asinh_u * zn_ref[...]

    # ---- nl: ReLU
    h = jnp.maximum(dist, 0.0)

    # ---- BatchNorm1d (training-mode batch stats), single reduction pass
    mean = jnp.sum(h, axis=0, keepdims=True) * inv_b
    ex2 = jnp.sum(h * h, axis=0, keepdims=True) * inv_b
    var = jnp.maximum(ex2 - mean * mean, 0.0)
    bn = (h - mean) * jax.lax.rsqrt(var + BN_EPS) * gamma_ref[...] + beta_ref[...]

    # ---- lift_map accumulator: sum over all feature columns of bn^2
    acc_ref[...] += jnp.sum(bn * bn, axis=-1, keepdims=True)

    out_ref[...] = bn

    @pl.when(j == pl.num_programs(0) - 1)
    def _finalize():
        # Last grid step maps onto feature block 0; its column 0 is the
        # reserved x0 slot (zero weight column -> bn there is exactly 0).
        out_ref[:, :1] = jnp.sqrt(acc_ref[...] + inv_c)


def hyperbolic_lorentz_pp(X, z, a, gamma, beta, *, c=1.0, block_n=None):
    B, d = X.shape
    in_dim, out_dim = z.shape
    assert d == in_dim + 1, "X must be Lorentz points of dim in_dim + 1"

    c_f = jnp.float32(c)
    c_sqrt = jnp.sqrt(c_f)

    # ---- get_w, hoisted out of the kernel (depends only on parameters) ----
    z_norm = jnp.sqrt(jnp.sum(z * z, axis=0, keepdims=True))        # (1, out)
    a_s = a / c_sqrt
    w0 = z_norm * jnp.sinh(a_s)                                     # (1, out)
    wr = jnp.cosh(a_s) * z                                          # (in, out)
    w_aug = jnp.concatenate([-w0, wr], axis=0)                      # (1+in, out)
    inv_denom = 1.0 / (jnp.maximum(z_norm, _Z_NORM_EPS) * c_sqrt)   # (1, out)

    # ---- fused output layout: col 0 = x0, cols 1..out_dim = bn features ----
    total = out_dim + 1
    if block_n is None:
        block_n = total if total <= 512 else 512
    tn = int(block_n)
    if tn >= total:
        tn = total
        num_tiles = 1
    else:
        if tn % 128 != 0:
            raise ValueError("block_n must be a multiple of 128 when tiling")
        num_tiles = -(-total // tn)
    t_pad = num_tiles * tn
    pad = t_pad - total

    def _pad_cols(m):
        # prepend the reserved (zero) x0 column, append zero tail padding
        cols = [jnp.zeros((m.shape[0], 1), jnp.float32), m.astype(jnp.float32)]
        if pad:
            cols.append(jnp.zeros((m.shape[0], pad), jnp.float32))
        return jnp.concatenate(cols, axis=1)

    w_p = _pad_cols(w_aug)          # (1+in_dim, t_pad)
    zn_p = _pad_cols(z_norm)        # (1, t_pad)
    invd_p = _pad_cols(inv_denom)   # (1, t_pad)
    g_p = _pad_cols(gamma)          # (1, t_pad)
    b_p = _pad_cols(beta)           # (1, t_pad)

    rev = lambda j: (0, num_tiles - 1 - j)   # reverse tile order (x0 tile last)

    out = pl.pallas_call(
        functools.partial(_hyperbolic_pp_kernel,
                          inv_c=float(1.0 / c), inv_b=float(1.0 / B)),
        grid=(num_tiles,),
        in_specs=[
            pl.BlockSpec((B, in_dim + 1), lambda j: (0, 0)),   # X, resident
            pl.BlockSpec((in_dim + 1, tn), rev),               # W_aug tile
            pl.BlockSpec((1, tn), rev),                        # ||z||
            pl.BlockSpec((1, tn), rev),                        # 1/(||z|| sqrt(c))
            pl.BlockSpec((1, tn), rev),                        # gamma
            pl.BlockSpec((1, tn), rev),                        # beta
        ],
        out_specs=pl.BlockSpec((B, tn), rev),
        out_shape=jax.ShapeDtypeStruct((B, t_pad), jnp.float32),
        scratch_shapes=[pltpu.VMEM((B, 1), jnp.float32)],      # sum(bn^2) acc
        compiler_params=pltpu.CompilerParams(
            dimension_semantics=("arbitrary",),   # x0 accumulates across tiles
            vmem_limit_bytes=32 * 1024 * 1024,
        ),
    )(X.astype(jnp.float32), w_p, zn_p, invd_p, g_p, b_p)

    return out if pad == 0 else out[:, :total]


def _reference(X, z, a, gamma, beta, *, c=1.0):
    """Pure-JAX reference of the torch forward (training-mode BN)."""
    c = jnp.float32(c)
    cs = jnp.sqrt(c)
    z_norm = jnp.sqrt(jnp.sum(z * z, axis=0, keepdims=True))
    w0 = z_norm * jnp.sinh(a / cs)
    wr = jnp.cosh(a / cs) * z
    num = -X[:, :1] * w0 + X[:, 1:] @ wr
    dist = jnp.arcsinh(num / (z_norm * cs)) * z_norm
    h = jnp.maximum(dist, 0.0)
    mean = jnp.mean(h, axis=0, keepdims=True)
    var = jnp.mean((h - mean) ** 2, axis=0, keepdims=True)
    bn = (h - mean) / jnp.sqrt(var + BN_EPS) * gamma + beta
    x0 = jnp.sqrt(jnp.sum(bn * bn, axis=-1, keepdims=True) + 1.0 / c)
    return jnp.concatenate([x0, bn], axis=1)


if __name__ == "__main__":
    def make_case(key, B, in_dim, out_dim, c):
        k_x, k_z, k_a = jax.random.split(key, 3)
        z = 0.5 * jax.random.normal(k_z, (in_dim, out_dim), dtype=jnp.float32)
        a = 0.5 * jax.random.normal(k_a, (1, out_dim), dtype=jnp.float32)
        gamma = jnp.ones((1, out_dim), jnp.float32)    # BatchNorm weight init
        beta = jnp.zeros((1, out_dim), jnp.float32)    # BatchNorm bias init
        xe = jax.random.normal(k_x, (B, in_dim), dtype=jnp.float32)
        x0 = jnp.sqrt(jnp.sum(xe * xe, axis=-1, keepdims=True) + 1.0 / c)
        X = jnp.concatenate([x0, xe], axis=1)          # valid Lorentz points
        return X, z, a, gamma, beta

    key = jax.random.PRNGKey(0)
    k1, k2 = jax.random.split(key)

    # Case 1: small shapes -> single fused (B, 1+out_dim) tile, no padding.
    X, z, a, g, b = make_case(k1, 8, 16, 32, 1.0)
    out = jax.block_until_ready(hyperbolic_lorentz_pp(X, z, a, g, b, c=1.0))
    ref = _reference(X, z, a, g, b, c=1.0)
    assert out.shape == (8, 33)
    assert bool(jnp.all(jnp.isfinite(out)))
    assert bool(jnp.allclose(out, ref, rtol=2e-3, atol=2e-3))

    # Case 2: exercises the multi-tile reverse-ordered feature grid + padding.
    X, z, a, g, b = make_case(k2, 16, 24, 200, 1.0)
    out = jax.block_until_ready(
        hyperbolic_lorentz_pp(X, z, a, g, b, c=1.0, block_n=128))
    ref = _reference(X, z, a, g, b, c=1.0)
    assert out.shape == (16, 201)
    assert bool(jnp.all(jnp.isfinite(out)))
    assert bool(jnp.allclose(out, ref, rtol=2e-3, atol=2e-3))

    print("KERNEL_OK")
</pallas_src>

<mosaic_0001>
module attributes {stable_mosaic.version = 11 : i64} {
  func.func @_hyperbolic_pp_kernel(%arg0: i32, %arg1: memref<8x17xf32, #tpu.memory_space<vmem>>, %arg2: memref<17x33xf32, #tpu.memory_space<vmem>>, %arg3: memref<1x33xf32, #tpu.memory_space<vmem>>, %arg4: memref<1x33xf32, #tpu.memory_space<vmem>>, %arg5: memref<1x33xf32, #tpu.memory_space<vmem>>, %arg6: memref<1x33xf32, #tpu.memory_space<vmem>>, %arg7: memref<8x33xf32, #tpu.memory_space<vmem>>, %arg8: memref<8x1xf32, #tpu.memory_space<vmem>>) attributes {dimension_semantics = [#tpu.dimension_semantics<arbitrary>], iteration_bounds = array<i64: 1>, scalar_prefetch = 0 : i64, scratch_operands = 1 : i64, tpu.core_type = #tpu.core_type<tc>, window_params = [{pipeline_mode = #tpu.pipeline_mode<synchronous>, transform_indices = @transform_0, window_bounds = array<i64: 8, 17>}, {transform_indices = @transform_1, window_bounds = array<i64: 17, 33>}, {transform_indices = @transform_2, window_bounds = array<i64: 1, 33>}, {transform_indices = @transform_3, window_bounds = array<i64: 1, 33>}, {transform_indices = @transform_4, window_bounds = array<i64: 1, 33>}, {transform_indices = @transform_5, window_bounds = array<i64: 1, 33>}, {transform_indices = @transform_6, window_bounds = array<i64: 8, 33>}]} {
    %c0_i32 = arith.constant 0 : i32
    %0 = arith.cmpi eq, %arg0, %c0_i32 : i32
    %1 = arith.extui %0 : i1 to i32
    %c0_i32_0 = arith.constant 0 : i32
    %2 = arith.cmpi ne, %1, %c0_i32_0 : i32
    scf.if %2 {
      %cst_32 = arith.constant 0.000000e+00 : f32
      %63 = vector.broadcast %cst_32 : f32 to vector<8x1xf32>
      %c0_33 = arith.constant 0 : index
      %c0_34 = arith.constant 0 : index
      %64 = vector.load %arg8[%c0_33, %c0_34] : memref<8x1xf32, #tpu.memory_space<vmem>>, vector<8x1xf32>
      tpu.vector_store %arg8[%c0_33, %c0_34], %63 {strides = array<i32>} : memref<8x1xf32, #tpu.memory_space<vmem>>, vector<8x1xf32>,
    } else {
    }
    %c0 = arith.constant 0 : index
    %c0_1 = arith.constant 0 : index
    %3 = vector.load %arg1[%c0, %c0_1] : memref<8x17xf32, #tpu.memory_space<vmem>>, vector<8x17xf32>
    %c0_2 = arith.constant 0 : index
    %c0_3 = arith.constant 0 : index
    %4 = vector.load %arg2[%c0_2, %c0_3] : memref<17x33xf32, #tpu.memory_space<vmem>>, vector<17x33xf32>
    %cst = arith.constant dense<0.000000e+00> : vector<8x33xf32>
    %5 = tpu.matmul %3, %4, %cst {dimension_numbers = #tpu.dot_dimension_numbers<[1], [0], [0], [1], [0, 0, 1, 1], [], []>} : vector<8x17xf32>, vector<17x33xf32>, vector<8x33xf32> -> vector<8x33xf32>
    %c0_4 = arith.constant 0 : index
    %c0_5 = arith.constant 0 : index
    %6 = vector.load %arg4[%c0_4, %c0_5] : memref<1x33xf32, #tpu.memory_space<vmem>>, vector<1x33xf32>
    %7 = vector.broadcast %6 : vector<1x33xf32> to vector<8x33xf32>
    %8 = arith.mulf %5, %7 : vector<8x33xf32>
    %9 = math.absf %8 : vector<8x33xf32>
    %cst_6 = arith.constant 0.000000e+00 : f32
    %10 = vector.broadcast %cst_6 : f32 to vector<8x33xf32>
    %11 = arith.cmpf olt, %8, %10 : vector<8x33xf32>
    %cst_7 = arith.constant -1.000000e+00 : f32
    %cst_8 = arith.constant 1.000000e+00 : f32
    %12 = vector.broadcast %cst_7 : f32 to vector<8x33xf32>
    %13 = vector.broadcast %cst_8 : f32 to vector<8x33xf32>
    %14 = arith.select %11, %12, %13 : vector<8x33xi1>, vector<8x33xf32>
    %15 = arith.mulf %9, %9 : vector<8x33xf32>
    %cst_9 = arith.constant 1.000000e+00 : f32
    %16 = vector.broadcast %cst_9 : f32 to vector<8x33xf32>
    %17 = arith.addf %15, %16 : vector<8x33xf32>
    %18 = math.sqrt %17 : vector<8x33xf32>
    %19 = arith.addf %9, %18 : vector<8x33xf32>
    %20 = math.log %19 : vector<8x33xf32>
    %21 = arith.mulf %14, %20 : vector<8x33xf32>
    %c0_10 = arith.constant 0 : index
    %c0_11 = arith.constant 0 : index
    %22 = vector.load %arg3[%c0_10, %c0_11] : memref<1x33xf32, #tpu.memory_space<vmem>>, vector<1x33xf32>
    %23 = vector.broadcast %22 : vector<1x33xf32> to vector<8x33xf32>
    %24 = arith.mulf %21, %23 : vector<8x33xf32>
    %cst_12 = arith.constant 0.000000e+00 : f32
    %25 = vector.broadcast %cst_12 : f32 to vector<8x33xf32>
    %26 = arith.maximumf %24, %25 : vector<8x33xf32>
    %cst_13 = arith.constant dense<0.000000e+00> : vector<33xf32>
    %27 = vector.multi_reduction <add>, %26, %cst_13 [0] : vector<8x33xf32> to vector<33xf32>
    %28 = vector.shape_cast %27 : vector<33xf32> to vector<1x33xf32>
    %cst_14 = arith.constant 1.250000e-01 : f32
    %29 = vector.broadcast %cst_14 : f32 to vector<1x33xf32>
    %30 = arith.mulf %28, %29 : vector<1x33xf32>
    %31 = arith.mulf %26, %26 : vector<8x33xf32>
    %cst_15 = arith.constant dense<0.000000e+00> : vector<33xf32>
    %32 = vector.multi_reduction <add>, %31, %cst_15 [0] : vector<8x33xf32> to vector<33xf32>
    %33 = vector.shape_cast %32 : vector<33xf32> to vector<1x33xf32>
    %cst_16 = arith.constant 1.250000e-01 : f32
    %34 = vector.broadcast %cst_16 : f32 to vector<1x33xf32>
    %35 = arith.mulf %33, %34 : vector<1x33xf32>
    %36 = arith.mulf %30, %30 : vector<1x33xf32>
    %37 = arith.subf %35, %36 : vector<1x33xf32>
    %cst_17 = arith.constant 0.000000e+00 : f32
    %38 = vector.broadcast %cst_17 : f32 to vector<1x33xf32>
    %39 = arith.maximumf %37, %38 : vector<1x33xf32>
    %40 = vector.broadcast %30 : vector<1x33xf32> to vector<8x33xf32>
    %41 = arith.subf %26, %40 : vector<8x33xf32>
    %cst_18 = arith.constant 9.99999974E-6 : f32
    %42 = vector.broadcast %cst_18 : f32 to vector<1x33xf32>
    %43 = arith.addf %39, %42 : vector<1x33xf32>
    %44 = math.rsqrt %43 : vector<1x33xf32>
    %45 = vector.broadcast %44 : vector<1x33xf32> to vector<8x33xf32>
    %46 = arith.mulf %41, %45 : vector<8x33xf32>
    %c0_19 = arith.constant 0 : index
    %c0_20 = arith.constant 0 : index
    %47 = vector.load %arg5[%c0_19, %c0_20] : memref<1x33xf32, #tpu.memory_space<vmem>>, vector<1x33xf32>
    %48 = vector.broadcast %47 : vector<1x33xf32> to vector<8x33xf32>
    %49 = arith.mulf %46, %48 : vector<8x33xf32>
    %c0_21 = arith.constant 0 : index
    %c0_22 = arith.constant 0 : index
    %50 = vector.load %arg6[%c0_21, %c0_22] : memref<1x33xf32, #tpu.memory_space<vmem>>, vector<1x33xf32>
    %51 = vector.broadcast %50 : vector<1x33xf32> to vector<8x33xf32>
    %52 = arith.addf %49, %51 : vector<8x33xf32>
    %c0_23 = arith.constant 0 : index
    %c0_24 = arith.constant 0 : index
    %53 = vector.load %arg8[%c0_23, %c0_24] : memref<8x1xf32, #tpu.memory_space<vmem>>, vector<8x1xf32>
    %54 = arith.mulf %52, %52 : vector<8x33xf32>
    %cst_25 = arith.constant dense<0.000000e+00> : vector<8xf32>
    %55 = vector.multi_reduction <add>, %54, %cst_25 [1] : vector<8x33xf32> to vector<8xf32>
    %56 = vector.shape_cast %55 : vector<8xf32> to vector<8x1xf32>
    %57 = arith.addf %53, %56 : vector<8x1xf32>
    %c0_26 = arith.constant 0 : index
    %c0_27 = arith.constant 0 : index
    %58 = vector.load %arg8[%c0_26, %c0_27] : memref<8x1xf32, #tpu.memory_space<vmem>>, vector<8x1xf32>
    tpu.vector_store %arg8[%c0_26, %c0_27], %57 {strides = array<i32>} : memref<8x1xf32, #tpu.memory_space<vmem>>, vector<8x1xf32>,
    %c0_28 = arith.constant 0 : index
    %c0_29 = arith.constant 0 : index
    %59 = vector.load %arg7[%c0_28, %c0_29] : memref<8x33xf32, #tpu.memory_space<vmem>>, vector<8x33xf32>
    tpu.vector_store %arg7[%c0_28, %c0_29], %52 {strides = array<i32>} : memref<8x33xf32, #tpu.memory_space<vmem>>, vector<8x33xf32>,
    %c0_i32_30 = arith.constant 0 : i32
    %60 = arith.cmpi eq, %arg0, %c0_i32_30 : i32
    %61 = arith.extui %60 : i1 to i32
    %c0_i32_31 = arith.constant 0 : i32
    %62 = arith.cmpi ne, %61, %c0_i32_31 : i32
    scf.if %62 {
      %c0_32 = arith.constant 0 : index
      %c0_33 = arith.constant 0 : index
      %63 = vector.load %arg8[%c0_32, %c0_33] : memref<8x1xf32, #tpu.memory_space<vmem>>, vector<8x1xf32>
      %cst_34 = arith.constant 1.000000e+00 : f32
      %64 = vector.broadcast %cst_34 : f32 to vector<8x1xf32>
      %65 = arith.addf %63, %64 : vector<8x1xf32>
      %66 = math.sqrt %65 : vector<8x1xf32>
      %c0_35 = arith.constant 0 : index
      %c0_36 = arith.constant 0 : index
      %67 = vector.load %arg7[%c0_35, %c0_36] : memref<8x33xf32, #tpu.memory_space<vmem>>, vector<8x1xf32>
      tpu.vector_store %arg7[%c0_35, %c0_36], %66 {strides = array<i32>} : memref<8x33xf32, #tpu.memory_space<vmem>>, vector<8x1xf32>,
    } else {
    }
    return
  }
  func.func @transform_0(%arg0: i32) -> (i32, i32) {
    %c0_i32 = arith.constant 0 : i32
    %c0_i32_0 = arith.constant 0 : i32
    %c0_i32_1 = arith.constant 0 : i32
    return %c0_i32, %c0_i32_0 : i32, i32
  }
  func.func @transform_1(%arg0: i32) -> (i32, i32) {
    %c0_i32 = arith.constant 0 : i32
    %0 = arith.subi %c0_i32, %arg0 : i32
    %c0_i32_0 = arith.constant 0 : i32
    %c0_i32_1 = arith.constant 0 : i32
    return %c0_i32_0, %0 : i32, i32
  }
  func.func @transform_2(%arg0: i32) -> (i32, i32) {
    %c0_i32 = arith.constant 0 : i32
    %0 = arith.subi %c0_i32, %arg0 : i32
    %c0_i32_0 = arith.constant 0 : i32
    %c0_i32_1 = arith.constant 0 : i32
    return %c0_i32_0, %0 : i32, i32
  }
  func.func @transform_3(%arg0: i32) -> (i32, i32) {
    %c0_i32 = arith.constant 0 : i32
    %0 = arith.subi %c0_i32, %arg0 : i32
    %c0_i32_0 = arith.constant 0 : i32
    %c0_i32_1 = arith.constant 0 : i32
    return %c0_i32_0, %0 : i32, i32
  }
  func.func @transform_4(%arg0: i32) -> (i32, i32) {
    %c0_i32 = arith.constant 0 : i32
    %0 = arith.subi %c0_i32, %arg0 : i32
    %c0_i32_0 = arith.constant 0 : i32
    %c0_i32_1 = arith.constant 0 : i32
    return %c0_i32_0, %0 : i32, i32
  }
  func.func @transform_5(%arg0: i32) -> (i32, i32) {
    %c0_i32 = arith.constant 0 : i32
    %0 = arith.subi %c0_i32, %arg0 : i32
    %c0_i32_0 = arith.constant 0 : i32
    %c0_i32_1 = arith.constant 0 : i32
    return %c0_i32_0, %0 : i32, i32
  }
  func.func @transform_6(%arg0: i32) -> (i32, i32) {
    %c0_i32 = arith.constant 0 : i32
    %0 = arith.subi %c0_i32, %arg0 : i32
    %c0_i32_0 = arith.constant 0 : i32
    %c0_i32_1 = arith.constant 0 : i32
    return %c0_i32_0, %0 : i32, i32
  }
}

</mosaic_0001>

<bundles_post_ra>
// kernel: tpu_custom_call.1
= control target key start
LH: loop header
LB: loop body
LE: loop exit
PB: predicated region body
PF: predicated region fallthrough
CT: control target
= control target key end

     0   :  { %11 = vsyncpa [#allocation4], 0  ;;  %s547_s0 = inlined_call_operand.hbm [shape: f32[8,17], index: 0, kind: input, shape index: {}]   ;;  %s548_s1 = inlined_call_operand.hbm [shape: f32[17,33], index: 1, kind: input, shape index: {}]   ;;  %s549_s2 = inlined_call_operand.vmem [shape: f32[1,33], index: 2, kind: input, shape index: {}]   ;;  %s550_s3 = inlined_call_operand.vmem [shape: f32[1,33], index: 3, kind: input, shape index: {}]   ;;  %s551_s4 = inlined_call_operand.vmem [shape: f32[1,33], index: 4, kind: input, shape index: {}]   ;;  %s552_s5 = inlined_call_operand.vmem [shape: f32[1,33], index: 5, kind: input, shape index: {}]   ;;  %s553_s6 = inlined_call_operand.hbm [shape: f32[8,33], index: 6, kind: output, shape index: {}]  }
   0x1   :  { %12 = vsyncpa [#allocation7], 0 }
   0x2   :  { %13 = vsyncpa [#allocation5], 0  ;;  %s441_s21 = smov [#allocation3]   ;;  %s442_s23 = smov [#allocation6]  }
   0x3   :  { %s20_s22 = sshll.u32 %s441_s21, 4  ;;  %s32_s24 = sshll.u32 %s442_s23, 4  ;;  %s21_s22 = int_to_ptr.vmem [resolvable:$true] %s20_s22  ;;  %s485_s24 = int_to_ptr.vmem [resolvable:$true] %s32_s24 }
   0x4   :  { %s369_s27 = scalar_lea.hbm %s547_s0, 128 }
   0x5   :  { %p370_p0 = scmp.ne.s32.totalorder %s547_s0, %s369_s27  ;;  %p373_p1 = scmp.lt.u32.totalorder %s369_s27, %s547_s0 }
   0x7   :  { %p375_p2 = pnand %p373_p1, %p370_p0 }
   0x9   :  { %378 = shalt.err (!%p375_p2)
}
   0xa   :  { %s379_s8 = scalar_lea.vmem %s21_s22, 128  ;;  %p384_p4 = scmp.lt.s32.totalorder %s21_s22, %s21_s22 }
   0xb   :  { %p380_p3 = scmp.ne.s32.totalorder %s21_s22, %s379_s8  ;;  %p385_p5 = scmp.lt.s32.totalorder %s379_s8, %s379_s8 }
   0xd   :  { %p386_p6 = por %p385_p5, %p384_p4 }
   0xf   :  { %p387_p7 = pnand %p386_p6, %p380_p3 }
  0x11   :  { %390 = shalt.err (!%p387_p7)
}
  0x12   :  { %23 = dma.hbm_to_vmem [thread:$0]  %s547_s0, 128, %s21_s22, [#allocation4]  }
  0x13   :  { %s391_s13 = scalar_lea.hbm %s548_s1, 384 }
  0x14   :  { %p392_p8 = scmp.ne.s32.totalorder %s548_s1, %s391_s13  ;;  %p395_p9 = scmp.lt.u32.totalorder %s391_s13, %s548_s1 }
  0x16   :  { %p397_p10 = pnand %p395_p9, %p392_p8 }
  0x18   :  { %400 = shalt.err (!%p397_p10)
}
  0x19   :  { %s401_s18 = scalar_lea.vmem %s485_s24, 384  ;;  %p406_p12 = scmp.lt.s32.totalorder %s485_s24, %s485_s24 }
  0x1a   :  { %p402_p11 = scmp.ne.s32.totalorder %s485_s24, %s401_s18  ;;  %p407_p13 = scmp.lt.s32.totalorder %s401_s18, %s401_s18 }
  0x1c   :  { %p408_p0 = por %p407_p13, %p406_p12 }
  0x1e   :  { %p409_p1 = pnand %p408_p0, %p402_p11 }
  0x20   :  { %412 = shalt.err (!%p409_p1)
}
  0x21   :  { %s443_s0 = smov 128   ;;  %s444_s19 = smov 8  }
  0x22   :  { %38 = dma.hbm_to_vmem [thread:$0]  %s548_s1, 384, %s485_s24, [#allocation7], %s443_s0, %s443_s0, %s444_s19  }
  0x23   :  { %435 = dma.done.wait [#allocation4], 128  }
  0x24   :  { %436 = vsyncadd [#allocation4], 4294967168 }
  0x25   :  { %437 = dma.done.wait [#allocation7], 384  }
  0x26   :  { %438 = vsyncadd [#allocation7], 4294966912  ;;  %vm115_vm0 = vcmask 7168   ;;  %v445_v0 = vmov 0.0|0.0   ;;  %v446_v1 = vmov 0.0   ;;  %vm447_vm1 = vmmov 0  }
  0x27   :  { %349 = vmatprep.subr.bf16.mxu0 %v445_v0  ;;  %116 = vst.msk [vmem:[#allocation2] sm:$0xff] %vm115_vm0, %v446_v1  ;;  %346 = vmatprep.mubr.msk.f32.mxu0 %vm447_vm1, %v446_v1  ;;  %v118_v2 = vld [vmem:[#allocation6] sm:$0xff]  ;;  %v119_v3 = vld [vmem:[#allocation6 + $0x8] sm:$0xff]  ;;  %v120_v5 = vld [vmem:[#allocation6 + $0x10] sm:$0x1]  ;;  %vm125_vm2 = vcmask 1040384  }
  0x28   :  { %v350_v4 = vpack.c.bf16 %v119_v3, %v118_v2  ;;  %v117_v6 = vld [vmem:[#allocation3] sm:$0xff]  ;;  %vm121_vm3 = vcmask 138240   ;;  %v332_v7 = vld [vmem:[%s550_s3] ss:$0 sm:$0xff]  ;;  %v448_v22 = vmov 1.0   ;;  %vm232_vm7 = vcmask 269312  }
  0x29   :  { %v333_v24 = vld [vmem:[%s549_s2] ss:$0 sm:$0xff] }
  0x2a   :  { %351 = vmatpush3.bf16.msra.mxu0 %v350_v4  ;;  %v334_v51 = vld [vmem:[%s551_s4] ss:$0 sm:$0xff]  ;;  %s449_s4 = smov [#allocation8]  }
  0x2b   :  { %344 = vmatprep.subr.mxu0 %v446_v1  ;;  %v335_v53 = vld [vmem:[%s552_s5] ss:$0 sm:$0xff]  ;;  %s304_s27 = sshll.u32 %s449_s4, 4  ;;  %s305_s27 = int_to_ptr.vmem [resolvable:$true] %s304_s27 }
  0x2c   :  { %s413_s5 = scalar_lea.vmem %s305_s27, 128  ;;  %p418_p3 = scmp.lt.s32.totalorder %s305_s27, %s305_s27 }
  0x2d   :  { %p414_p2 = scmp.ne.s32.totalorder %s305_s27, %s413_s5  ;;  %p419_p4 = scmp.lt.s32.totalorder %s413_s5, %s413_s5 }
  0x2e   :  { %345 = vmatpush3.msk.msra.mxu0 %vm125_vm2, %v120_v5  ;;  %v273_v58 = vld [vmem:[#allocation2] sm:$0xff] }
  0x2f   :  { %347 = vmatmul.mubr.msk.f32.vlgmr.msra.gmra.mrb[0].mxu0 %vm121_vm3, %v117_v6  ;;  %p420_p5 = por %p419_p4, %p418_p3 }
  0x31   :  { %p421_p6 = pnand %p420_p5, %p414_p2 }
 0x102   :  { %v195_v8 = vpop.f32.mrb[0].mxu0 }
 0x103   :  { %v206_v9 = vmul.f32 %v332_v7, %v195_v8  ;;  %v348_v10 = vpop.f32.mrb[1].mxu0 }
 0x105   :  { %v207_v11 = vand.u32 2147483647, %v206_v9  ;;  %vm208_vm6 = vcmp.lt.f32.partialorder %v206_v9, 0.0 }
 0x106   :  { %v209_v23 = vsel %vm208_vm6, -1.0, %v448_v22 }
 0x107   :  { %v210_v12 = vmul.f32 %v207_v11, %v207_v11 }
 0x109   :  { %v211_v13 = vadd.f32 1.0, %v210_v12 }
 0x10b   :  { %361 = vrsqrt.f32 %v211_v13  ;;  %vm214_vm4 = vcmp.eq.f32.partialorder %v211_v13, inf  ;;  %v217_v16 = vand.u32 2147483648, %v211_v13  ;;  %vm216_vm5 = vcmp.eq.f32.partialorder %v211_v13, 0.0 }
 0x115   :  { %v362_v14 = vpop.eup %361 }
 0x116   :  { %v213_v15 = vmul.f32 %v362_v14, %v211_v13 }
 0x118   :  { %v215_v17 = vsel %vm214_vm4, %v211_v13, %v213_v15 }
 0x119   :  { %v218_v18 = vsel %vm216_vm5, %v217_v16, %v215_v17 }
 0x11a   :  { %v219_v19 = vadd.f32 %v218_v18, %v207_v11 }
 0x11c   :  { %363 = vlog2.f32 %v219_v19 }
 0x126   :  { %v364_v20 = vpop.eup %363 }
 0x127   :  { %v221_v21 = vmul.f32 0.6931472, %v364_v20 }
 0x129   :  { %v222_v25 = vmul.f32 %v221_v21, %v209_v23 }
 0x12b   :  { %v230_v26 = vmul.f32 %v333_v24, %v222_v25 }
 0x12d   :  { %v231_v27 = vmax.f32 %v230_v26, 0.0 }
 0x12f   :  { %v233_v28 = vsel %vm232_vm7, %v231_v27, 0.0  ;;  %v241_v29 = vmul.f32 %v231_v27, %v231_v27 }
 0x130   :  { %v234_v30 = vrot.slane %v233_v28, 4 }
 0x131   :  { %v242_v31 = vsel %vm232_vm7, %v241_v29, 0.0 }
 0x132   :  { %v235_v32 = vadd.f32 %v234_v30, %v233_v28  ;;  %v243_v33 = vrot.slane %v242_v31, 4 }
 0x134   :  { %v236_v34 = vrot.slane %v235_v32, 2  ;;  %v244_v35 = vadd.f32 %v243_v33, %v242_v31 }
 0x136   :  { %v237_v36 = vadd.f32 %v236_v34, %v235_v32  ;;  %v245_v37 = vrot.slane %v244_v35, 2 }
 0x138   :  { %v238_v38 = vrot.slane %v237_v36, 1  ;;  %v246_v39 = vadd.f32 %v245_v37, %v244_v35 }
 0x13a   :  { %v239_v40 = vadd.f32 %v238_v38, %v237_v36  ;;  %v247_v41 = vrot.slane %v246_v39, 1 }
 0x13c   :  { %v240_v42 = vmul.f32 0.125, %v239_v40  ;;  %v248_v43 = vadd.f32 %v247_v41, %v246_v39 }
 0x13e   :  { %v249_v44 = vmul.f32 0.125, %v248_v43  ;;  %v250_v45 = vmul.f32 %v240_v42, %v240_v42  ;;  %v253_v49 = vsub.f32 %v231_v27, %v240_v42 }
 0x140   :  { %v251_v46 = vsub.f32 %v249_v44, %v250_v45 }
 0x142   :  { %v252_v47 = vmax.f32 %v251_v46, 0.0 }
 0x144   :  { %v254_v48 = vadd.f32 1e-05, %v252_v47 }
 0x146   :  { %365 = vrsqrt.f32 %v254_v48 }
 0x150   :  { %v366_v50 = vpop.eup %365 }
 0x151   :  { %v256_v52 = vmul.f32 %v366_v50, %v253_v49 }
 0x153   :  { %v264_v54 = vmul.f32 %v334_v51, %v256_v52 }
 0x155   :  { %v272_v55 = vadd.f32 %v335_v53, %v264_v54 }
 0x157   :  { %v274_v56 = vmul.f32 %v272_v55, %v272_v55  ;;  %281 = vst.msk [vmem:[#allocation8] sm:$0xff] %vm232_vm7, %v272_v55 }
 0x159   :  { %v275_v57 = vsel %vm232_vm7, %v274_v56, 0.0 }
 0x15a   :  { %276 = vadd.xlane.f32.xlu0 %v275_v57 }
 0x1e7   :  { %v277_v59 = vpop.xlane.xlu0 %276 }
 0x1e8   :  { %v278_v60 = vadd.f32 %v277_v59, %v273_v58 }
 0x1ea   :  { %280 = vst.msk [vmem:[#allocation2] sm:$0xff] %vm115_vm0, %v278_v60 }
 0x1f1   :  { %v285_v61 = vld [vmem:[#allocation2] sm:$0xff] }
 0x1f2   :  { %v286_v62 = vadd.f32 1.0, %v285_v61 }
 0x1f4   :  { %367 = vrsqrt.f32 %v286_v62  ;;  %vm289_vm8 = vcmp.eq.f32.partialorder %v286_v62, inf  ;;  %v292_v1 = vand.u32 2147483648, %v286_v62  ;;  %vm291_vm9 = vcmp.eq.f32.partialorder %v286_v62, 0.0 }
 0x1fe   :  { %v368_v63 = vpop.eup %367 }
 0x1ff   :  { %v288_v0 = vmul.f32 %v368_v63, %v286_v62 }
 0x201   :  { %v290_v2 = vsel %vm289_vm8, %v286_v62, %v288_v0 }
 0x202   :  { %v293_v3 = vsel %vm291_vm9, %v292_v1, %v290_v2 }
 0x203   :  { %294 = vst.msk [vmem:[#allocation8] sm:$0xff] %vm115_vm0, %v293_v3 }
 0x204   :  { %424 = shalt.err (!%p421_p6)
}
 0x205   :  { %s425_s30 = scalar_lea.hbm %s553_s6, 128 }
 0x206   :  { %p426_p7 = scmp.ne.s32.totalorder %s553_s6, %s425_s30  ;;  %p429_p8 = scmp.lt.u32.totalorder %s425_s30, %s553_s6 }
 0x208   :  { %p431_p9 = pnand %p429_p8, %p426_p7 }
 0x20a   :  { %434 = shalt.err (!%p431_p9)
}
 0x20b   :  { %307 = dma.vmem_to_hbm [thread:$0]  %s305_s27, 128, %s553_s6, [#allocation5]  }
 0x20c   :  { %439 = dma.done.wait [#allocation5], 128  }
 0x20d   :  { %440 = vsyncadd [#allocation5], 4294967168 }
 0x20e   :  { %311 = vsyncpa [#allocation4], 1 }
 0x20f   :  { %312 = vsyncpa [#allocation7], 1 }
 0x210   :  { %313 = vsyncpa [#allocation5], 1 }

</bundles_post_ra>
